<compile_context>
chip_gen: v7x
topology: tpu7x:2x2x1
jax: 0.10.0
libtpu: 0.0.40
codegen_flags: <defaults>
</compile_context>

<pallas_src>
import functools
import math

import jax
import jax.numpy as jnp
from jax.experimental import pallas as pl
from jax.experimental.pallas import tpu as pltpu


def _fused_sampler_kernel(params_ref, w_ref, x_ref, eps_ref, o_ref, acc_ref,
                          *, cond_scale, num_steps):
    """Fused v-diffusion sampler: all steps for one M-tile.

    Grid: (m_tiles, num_steps); state lives in acc_ref across the step axis.

    params (SMEM, f32[num_steps, 8]) rows:
      0: alpha_t
      1: sigma_t
      2: coef_x      = alpha_s * (1 - c) / alpha_t
      3: coef_xpred  = alpha_s * c
      4: noise_scale = sqrt(sigma_s**2 * c)   (0.0 when t_next == 0)
      5..7: padding (unused)
    """
    s = pl.program_id(1)          # step index (innermost grid axis)
    last = num_steps - 1          # static
    C = acc_ref.shape[0]

    # ---- init: load x tile into the resident VMEM accumulator ----
    @pl.when(s == 0)
    def _():
        acc_ref[...] = x_ref[...]

    alpha_t = params_ref[s, 0]
    sigma_t = params_ref[s, 1]
    coef_x = params_ref[s, 2]
    coef_xp = params_ref[s, 3]
    noise_scale = params_ref[s, 4]

    x = acc_ref[...]                     # (C, TILE_M) float32

    # Synthetic denoiser standing in for the external `fn(x, net=net, ...)`:
    # per-pixel channel mixing + tanh, scaled by cond_scale.
    # Unrolled VPU FMAs over the C channels (w scalars from SMEM) — no MXU.
    # TODO(synk): the real module calls an arbitrary external network here.
    rows = []
    for i in range(C):
        r = w_ref[i, 0] * x[0:1, :]
        for j in range(1, C):
            r = r + w_ref[i, j] * x[j:j + 1, :]
        rows.append(r)
    v_pred = cond_scale * jnp.tanh(jnp.concatenate(rows, axis=0))

    # x_pred = clamp(alpha_t * x - sigma_t * v_pred, -1, 1)
    x_pred = jnp.clip(alpha_t * x - sigma_t * v_pred, -1.0, 1.0)

    # mu = alpha_s * (x * (1 - c) / alpha_t + c * x_pred)
    # stochastic part fused in: noise_scale == 0.0 exactly when t_next == 0,
    # which reproduces the reference's `if t_next != 0` branch.
    acc_ref[...] = coef_x * x + coef_xp * x_pred + noise_scale * eps_ref[0]

    # ---- finalize: clamp and emit the output tile ----
    @pl.when(s == last)
    def _():
        o_ref[...] = jnp.clip(acc_ref[...], -1.0, 1.0)


@functools.partial(jax.jit, static_argnames=("tile_m", "cond_scale"))
def _vsampler_forward(noise, params, w, key, *, tile_m, cond_scale):
    """NCHW noise -> NCHW sample, one fused pallas_call for all steps."""
    N, C, H, W = noise.shape
    M = N * H * W
    num_steps = params.shape[0]

    # NCHW -> (C, N*H*W): channels on sublanes, flat batch*spatial on lanes.
    x = jnp.transpose(noise, (1, 0, 2, 3)).reshape(C, M).astype(jnp.float32)

    m_pad = pl.cdiv(M, tile_m) * tile_m
    if m_pad != M:
        x = jnp.pad(x, ((0, 0), (0, m_pad - M)))

    # Per-step Gaussian noise, streamed tile-by-tile into the kernel.
    eps = jax.random.normal(key, (num_steps, C, m_pad), dtype=jnp.float32)

    grid = (m_pad // tile_m, num_steps)
    kernel = functools.partial(_fused_sampler_kernel,
                               cond_scale=cond_scale, num_steps=num_steps)

    out = pl.pallas_call(
        kernel,
        out_shape=jax.ShapeDtypeStruct((C, m_pad), jnp.float32),
        grid_spec=pltpu.PrefetchScalarGridSpec(
            num_scalar_prefetch=0,
            grid=grid,
            in_specs=[
                pl.BlockSpec(memory_space=pltpu.MemorySpace.SMEM),     # params
                pl.BlockSpec(memory_space=pltpu.MemorySpace.SMEM),     # w (C,C)
                pl.BlockSpec((C, tile_m), lambda m, s: (0, m)),        # x tile
                pl.BlockSpec((1, C, tile_m), lambda m, s: (s, 0, m)),  # eps
            ],
            out_specs=pl.BlockSpec((C, tile_m), lambda m, s: (0, m)),
            scratch_shapes=[pltpu.VMEM((C, tile_m), jnp.float32)],     # x state
        ),
        compiler_params=pltpu.CompilerParams(
            dimension_semantics=("parallel", "arbitrary")),
    )(params, w, x, eps)

    out = out[:, :M]
    return jnp.transpose(out.reshape(C, N, H, W), (1, 0, 2, 3))


class VSampler:
    """JAX/Pallas port of the PyTorch VSampler forward pass."""

    def __init__(self, logsnr_min=-15.0, logsnr_max=15.0, shift=0.0,
                 num_steps=8, cond_scale=1.0, channels=4):
        self.logsnr_min = float(logsnr_min)
        self.logsnr_max = float(logsnr_max)
        self.shift = float(shift)
        self.num_steps = int(num_steps)
        self.cond_scale = float(cond_scale)
        # Deterministic synthetic denoiser parameters (channel-mixing matrix).
        wkey = jax.random.PRNGKey(42)
        self.w = (0.1 * jax.random.normal(wkey, (channels, channels))
                  ).astype(jnp.float32)

    def shifted_cosine_transform(self, t):
        t_min = math.atan(math.exp(-0.5 * self.logsnr_max))
        t_max = math.atan(math.exp(-0.5 * self.logsnr_min))
        return -2.0 * jnp.log(jnp.tan(t_min + t * (t_max - t_min))) + 2.0 * self.shift

    def _all_step_params(self, sigmas_ext):
        """Vectorized per-step scalar table, shape (num_steps, 8)."""
        t = sigmas_ext[:-1]
        t_next = sigmas_ext[1:]
        logsnr_t = self.shifted_cosine_transform(t)
        logsnr_s = self.shifted_cosine_transform(t_next)
        alpha_t = jnp.sqrt(jax.nn.sigmoid(logsnr_t))
        sigma_t = jnp.sqrt(jax.nn.sigmoid(-logsnr_t))
        alpha_s = jnp.sqrt(jax.nn.sigmoid(logsnr_s))
        sigma_s = jnp.sqrt(jax.nn.sigmoid(-logsnr_s))
        c = -jnp.expm1(logsnr_t - logsnr_s)
        coef_x = alpha_s * (1.0 - c) / alpha_t
        coef_xp = alpha_s * c
        variance = sigma_s ** 2 * c
        noise_scale = jnp.where(t_next != 0.0, jnp.sqrt(variance), 0.0)
        zeros = jnp.zeros_like(alpha_t)
        params = jnp.stack(
            [alpha_t, sigma_t, coef_x, coef_xp, noise_scale, zeros, zeros, zeros],
            axis=1)
        return params.astype(jnp.float32)

    def forward(self, noise, sigmas, key):
        """noise: NCHW float32; sigmas: (num_steps,) float32."""
        N, C, H, W = noise.shape
        M = N * H * W

        # sigmas = cat([sigmas, zeros_like(sigmas[:1])])
        sigmas_ext = jnp.concatenate([sigmas, jnp.zeros_like(sigmas[:1])])
        params = self._all_step_params(sigmas_ext)

        # Lane-dense M tiling; tiny VMEM footprint on every TPU generation.
        m_128 = max(128, pl.cdiv(M, 128) * 128)
        tile_m = min(2048, m_128)

        return _vsampler_forward(noise, params, self.w, key,
                                 tile_m=int(tile_m),
                                 cond_scale=self.cond_scale)


if __name__ == "__main__":
    key = jax.random.PRNGKey(0)
    nkey, skey = jax.random.split(key)

    N, C, H, W = 2, 4, 16, 16
    num_steps = 8

    noise = jax.random.normal(nkey, (N, C, H, W), dtype=jnp.float32)
    # Descending time schedule in (0, 1], as the diffusion sampler expects.
    sigmas = jnp.linspace(1.0, 1.0 / num_steps, num_steps).astype(jnp.float32)

    sampler = VSampler(logsnr_min=-15.0, logsnr_max=15.0, shift=0.0,
                       num_steps=num_steps, cond_scale=1.0, channels=C)

    out = sampler.forward(noise, sigmas, skey)
    out = jax.block_until_ready(out)

    assert out.shape == (N, C, H, W)
    assert bool(jnp.all(jnp.isfinite(out)))
    assert bool(jnp.all(out <= 1.0)) and bool(jnp.all(out >= -1.0))
    print("KERNEL_OK")
</pallas_src>

<mosaic_0001>
module attributes {stable_mosaic.version = 11 : i64} {
  func.func @_fused_sampler_kernel(%arg0: i32, %arg1: i32, %arg2: memref<8x8xf32, #tpu.memory_space<smem>>, %arg3: memref<4x4xf32, #tpu.memory_space<smem>>, %arg4: memref<4x512xf32, #tpu.memory_space<vmem>>, %arg5: memref<1x4x512xf32, #tpu.memory_space<vmem>>, %arg6: memref<4x512xf32, #tpu.memory_space<vmem>>, %arg7: memref<4x512xf32, #tpu.memory_space<vmem>>) attributes {dimension_semantics = [#tpu.dimension_semantics<parallel>, #tpu.dimension_semantics<arbitrary>], iteration_bounds = array<i64: 1, 8>, scalar_prefetch = 0 : i64, scratch_operands = 1 : i64, tpu.core_type = #tpu.core_type<tc>, window_params = [{transform_indices = @transform_0, window_bounds = array<i64: 8, 8>}, {transform_indices = @transform_1, window_bounds = array<i64: 4, 4>}, {transform_indices = @transform_2, window_bounds = array<i64: 4, 512>}, {transform_indices = @transform_3, window_bounds = array<i64: 1, 4, 512>}, {transform_indices = @transform_4, window_bounds = array<i64: 4, 512>}]} {
    %c0_i32 = arith.constant 0 : i32
    %0 = arith.cmpi eq, %arg1, %c0_i32 : i32
    %1 = arith.extui %0 : i1 to i32
    %c0_i32_0 = arith.constant 0 : i32
    %2 = arith.cmpi ne, %1, %c0_i32_0 : i32
    scf.if %2 {
      %c0_43 = arith.constant 0 : index
      %c0_44 = arith.constant 0 : index
      %117 = vector.load %arg4[%c0_43, %c0_44] : memref<4x512xf32, #tpu.memory_space<vmem>>, vector<4x512xf32>
      %c0_45 = arith.constant 0 : index
      %c0_46 = arith.constant 0 : index
      %118 = vector.load %arg7[%c0_45, %c0_46] : memref<4x512xf32, #tpu.memory_space<vmem>>, vector<4x512xf32>
      tpu.vector_store %arg7[%c0_45, %c0_46], %117 {strides = array<i32>} : memref<4x512xf32, #tpu.memory_space<vmem>>, vector<4x512xf32>,
    } else {
    }
    %3 = arith.index_cast %arg1 : i32 to index
    %c0 = arith.constant 0 : index
    %4 = memref.load %arg2[%3, %c0] : memref<8x8xf32, #tpu.memory_space<smem>>
    %5 = arith.index_cast %arg1 : i32 to index
    %c1 = arith.constant 1 : index
    %6 = memref.load %arg2[%5, %c1] : memref<8x8xf32, #tpu.memory_space<smem>>
    %7 = arith.index_cast %arg1 : i32 to index
    %c2 = arith.constant 2 : index
    %8 = memref.load %arg2[%7, %c2] : memref<8x8xf32, #tpu.memory_space<smem>>
    %9 = arith.index_cast %arg1 : i32 to index
    %c3 = arith.constant 3 : index
    %10 = memref.load %arg2[%9, %c3] : memref<8x8xf32, #tpu.memory_space<smem>>
    %11 = arith.index_cast %arg1 : i32 to index
    %c4 = arith.constant 4 : index
    %12 = memref.load %arg2[%11, %c4] : memref<8x8xf32, #tpu.memory_space<smem>>
    %c0_1 = arith.constant 0 : index
    %c0_2 = arith.constant 0 : index
    %13 = vector.load %arg7[%c0_1, %c0_2] : memref<4x512xf32, #tpu.memory_space<vmem>>, vector<4x512xf32>
    %c0_3 = arith.constant 0 : index
    %c0_4 = arith.constant 0 : index
    %14 = memref.load %arg3[%c0_3, %c0_4] : memref<4x4xf32, #tpu.memory_space<smem>>
    %15 = vector.extract_strided_slice %13 {offsets = [0, 0], sizes = [1, 512], strides = [1, 1]} : vector<4x512xf32> to vector<1x512xf32>
    %16 = vector.broadcast %14 : f32 to vector<1x512xf32>
    %17 = arith.mulf %16, %15 : vector<1x512xf32>
    %c0_5 = arith.constant 0 : index
    %c1_6 = arith.constant 1 : index
    %18 = memref.load %arg3[%c0_5, %c1_6] : memref<4x4xf32, #tpu.memory_space<smem>>
    %19 = vector.extract_strided_slice %13 {offsets = [1, 0], sizes = [1, 512], strides = [1, 1]} : vector<4x512xf32> to vector<1x512xf32>
    %20 = vector.broadcast %18 : f32 to vector<1x512xf32>
    %21 = arith.mulf %20, %19 : vector<1x512xf32>
    %22 = arith.addf %17, %21 : vector<1x512xf32>
    %c0_7 = arith.constant 0 : index
    %c2_8 = arith.constant 2 : index
    %23 = memref.load %arg3[%c0_7, %c2_8] : memref<4x4xf32, #tpu.memory_space<smem>>
    %24 = vector.extract_strided_slice %13 {offsets = [2, 0], sizes = [1, 512], strides = [1, 1]} : vector<4x512xf32> to vector<1x512xf32>
    %25 = vector.broadcast %23 : f32 to vector<1x512xf32>
    %26 = arith.mulf %25, %24 : vector<1x512xf32>
    %27 = arith.addf %22, %26 : vector<1x512xf32>
    %c0_9 = arith.constant 0 : index
    %c3_10 = arith.constant 3 : index
    %28 = memref.load %arg3[%c0_9, %c3_10] : memref<4x4xf32, #tpu.memory_space<smem>>
    %29 = vector.extract_strided_slice %13 {offsets = [3, 0], sizes = [1, 512], strides = [1, 1]} : vector<4x512xf32> to vector<1x512xf32>
    %30 = vector.broadcast %28 : f32 to vector<1x512xf32>
    %31 = arith.mulf %30, %29 : vector<1x512xf32>
    %32 = arith.addf %27, %31 : vector<1x512xf32>
    %c1_11 = arith.constant 1 : index
    %c0_12 = arith.constant 0 : index
    %33 = memref.load %arg3[%c1_11, %c0_12] : memref<4x4xf32, #tpu.memory_space<smem>>
    %34 = vector.extract_strided_slice %13 {offsets = [0, 0], sizes = [1, 512], strides = [1, 1]} : vector<4x512xf32> to vector<1x512xf32>
    %35 = vector.broadcast %33 : f32 to vector<1x512xf32>
    %36 = arith.mulf %35, %34 : vector<1x512xf32>
    %c1_13 = arith.constant 1 : index
    %c1_14 = arith.constant 1 : index
    %37 = memref.load %arg3[%c1_13, %c1_14] : memref<4x4xf32, #tpu.memory_space<smem>>
    %38 = vector.extract_strided_slice %13 {offsets = [1, 0], sizes = [1, 512], strides = [1, 1]} : vector<4x512xf32> to vector<1x512xf32>
    %39 = vector.broadcast %37 : f32 to vector<1x512xf32>
    %40 = arith.mulf %39, %38 : vector<1x512xf32>
    %41 = arith.addf %36, %40 : vector<1x512xf32>
    %c1_15 = arith.constant 1 : index
    %c2_16 = arith.constant 2 : index
    %42 = memref.load %arg3[%c1_15, %c2_16] : memref<4x4xf32, #tpu.memory_space<smem>>
    %43 = vector.extract_strided_slice %13 {offsets = [2, 0], sizes = [1, 512], strides = [1, 1]} : vector<4x512xf32> to vector<1x512xf32>
    %44 = vector.broadcast %42 : f32 to vector<1x512xf32>
    %45 = arith.mulf %44, %43 : vector<1x512xf32>
    %46 = arith.addf %41, %45 : vector<1x512xf32>
    %c1_17 = arith.constant 1 : index
    %c3_18 = arith.constant 3 : index
    %47 = memref.load %arg3[%c1_17, %c3_18] : memref<4x4xf32, #tpu.memory_space<smem>>
    %48 = vector.extract_strided_slice %13 {offsets = [3, 0], sizes = [1, 512], strides = [1, 1]} : vector<4x512xf32> to vector<1x512xf32>
    %49 = vector.broadcast %47 : f32 to vector<1x512xf32>
    %50 = arith.mulf %49, %48 : vector<1x512xf32>
    %51 = arith.addf %46, %50 : vector<1x512xf32>
    %c2_19 = arith.constant 2 : index
    %c0_20 = arith.constant 0 : index
    %52 = memref.load %arg3[%c2_19, %c0_20] : memref<4x4xf32, #tpu.memory_space<smem>>
    %53 = vector.extract_strided_slice %13 {offsets = [0, 0], sizes = [1, 512], strides = [1, 1]} : vector<4x512xf32> to vector<1x512xf32>
    %54 = vector.broadcast %52 : f32 to vector<1x512xf32>
    %55 = arith.mulf %54, %53 : vector<1x512xf32>
    %c2_21 = arith.constant 2 : index
    %c1_22 = arith.constant 1 : index
    %56 = memref.load %arg3[%c2_21, %c1_22] : memref<4x4xf32, #tpu.memory_space<smem>>
    %57 = vector.extract_strided_slice %13 {offsets = [1, 0], sizes = [1, 512], strides = [1, 1]} : vector<4x512xf32> to vector<1x512xf32>
    %58 = vector.broadcast %56 : f32 to vector<1x512xf32>
    %59 = arith.mulf %58, %57 : vector<1x512xf32>
    %60 = arith.addf %55, %59 : vector<1x512xf32>
    %c2_23 = arith.constant 2 : index
    %c2_24 = arith.constant 2 : index
    %61 = memref.load %arg3[%c2_23, %c2_24] : memref<4x4xf32, #tpu.memory_space<smem>>
    %62 = vector.extract_strided_slice %13 {offsets = [2, 0], sizes = [1, 512], strides = [1, 1]} : vector<4x512xf32> to vector<1x512xf32>
    %63 = vector.broadcast %61 : f32 to vector<1x512xf32>
    %64 = arith.mulf %63, %62 : vector<1x512xf32>
    %65 = arith.addf %60, %64 : vector<1x512xf32>
    %c2_25 = arith.constant 2 : index
    %c3_26 = arith.constant 3 : index
    %66 = memref.load %arg3[%c2_25, %c3_26] : memref<4x4xf32, #tpu.memory_space<smem>>
    %67 = vector.extract_strided_slice %13 {offsets = [3, 0], sizes = [1, 512], strides = [1, 1]} : vector<4x512xf32> to vector<1x512xf32>
    %68 = vector.broadcast %66 : f32 to vector<1x512xf32>
    %69 = arith.mulf %68, %67 : vector<1x512xf32>
    %70 = arith.addf %65, %69 : vector<1x512xf32>
    %c3_27 = arith.constant 3 : index
    %c0_28 = arith.constant 0 : index
    %71 = memref.load %arg3[%c3_27, %c0_28] : memref<4x4xf32, #tpu.memory_space<smem>>
    %72 = vector.extract_strided_slice %13 {offsets = [0, 0], sizes = [1, 512], strides = [1, 1]} : vector<4x512xf32> to vector<1x512xf32>
    %73 = vector.broadcast %71 : f32 to vector<1x512xf32>
    %74 = arith.mulf %73, %72 : vector<1x512xf32>
    %c3_29 = arith.constant 3 : index
    %c1_30 = arith.constant 1 : index
    %75 = memref.load %arg3[%c3_29, %c1_30] : memref<4x4xf32, #tpu.memory_space<smem>>
    %76 = vector.extract_strided_slice %13 {offsets = [1, 0], sizes = [1, 512], strides = [1, 1]} : vector<4x512xf32> to vector<1x512xf32>
    %77 = vector.broadcast %75 : f32 to vector<1x512xf32>
    %78 = arith.mulf %77, %76 : vector<1x512xf32>
    %79 = arith.addf %74, %78 : vector<1x512xf32>
    %c3_31 = arith.constant 3 : index
    %c2_32 = arith.constant 2 : index
    %80 = memref.load %arg3[%c3_31, %c2_32] : memref<4x4xf32, #tpu.memory_space<smem>>
    %81 = vector.extract_strided_slice %13 {offsets = [2, 0], sizes = [1, 512], strides = [1, 1]} : vector<4x512xf32> to vector<1x512xf32>
    %82 = vector.broadcast %80 : f32 to vector<1x512xf32>
    %83 = arith.mulf %82, %81 : vector<1x512xf32>
    %84 = arith.addf %79, %83 : vector<1x512xf32>
    %c3_33 = arith.constant 3 : index
    %c3_34 = arith.constant 3 : index
    %85 = memref.load %arg3[%c3_33, %c3_34] : memref<4x4xf32, #tpu.memory_space<smem>>
    %86 = vector.extract_strided_slice %13 {offsets = [3, 0], sizes = [1, 512], strides = [1, 1]} : vector<4x512xf32> to vector<1x512xf32>
    %87 = vector.broadcast %85 : f32 to vector<1x512xf32>
    %88 = arith.mulf %87, %86 : vector<1x512xf32>
    %89 = arith.addf %84, %88 : vector<1x512xf32>
    %90 = tpu.concatenate %32, %51, %70, %89 in 0 : vector<1x512xf32>, vector<1x512xf32>, vector<1x512xf32>, vector<1x512xf32> -> vector<4x512xf32>
    %91 = math.tanh %90 : vector<4x512xf32>
    %cst = arith.constant 1.000000e+00 : f32
    %92 = vector.broadcast %cst : f32 to vector<4x512xf32>
    %93 = arith.mulf %92, %91 : vector<4x512xf32>
    %94 = vector.broadcast %4 : f32 to vector<4x512xf32>
    %95 = arith.mulf %94, %13 : vector<4x512xf32>
    %96 = vector.broadcast %6 : f32 to vector<4x512xf32>
    %97 = arith.mulf %96, %93 : vector<4x512xf32>
    %98 = arith.subf %95, %97 : vector<4x512xf32>
    %cst_35 = arith.constant -1.000000e+00 : f32
    %cst_36 = arith.constant 1.000000e+00 : f32
    %99 = vector.broadcast %cst_35 : f32 to vector<4x512xf32>
    %100 = arith.maximumf %99, %98 : vector<4x512xf32>
    %101 = vector.broadcast %cst_36 : f32 to vector<4x512xf32>
    %102 = arith.minimumf %101, %100 : vector<4x512xf32>
    %103 = vector.broadcast %8 : f32 to vector<4x512xf32>
    %104 = arith.mulf %103, %13 : vector<4x512xf32>
    %105 = vector.broadcast %10 : f32 to vector<4x512xf32>
    %106 = arith.mulf %105, %102 : vector<4x512xf32>
    %107 = arith.addf %104, %106 : vector<4x512xf32>
    %c0_37 = arith.constant 0 : index
    %c0_38 = arith.constant 0 : index
    %c0_39 = arith.constant 0 : index
    %108 = vector.load %arg5[%c0_37, %c0_38, %c0_39] : memref<1x4x512xf32, #tpu.memory_space<vmem>>, vector<1x4x512xf32>
    %109 = vector.shape_cast %108 : vector<1x4x512xf32> to vector<4x512xf32>
    %110 = vector.broadcast %12 : f32 to vector<4x512xf32>
    %111 = arith.mulf %110, %109 : vector<4x512xf32>
    %112 = arith.addf %107, %111 : vector<4x512xf32>
    %c0_40 = arith.constant 0 : index
    %c0_41 = arith.constant 0 : index
    %113 = vector.load %arg7[%c0_40, %c0_41] : memref<4x512xf32, #tpu.memory_space<vmem>>, vector<4x512xf32>
    tpu.vector_store %arg7[%c0_40, %c0_41], %112 {strides = array<i32>} : memref<4x512xf32, #tpu.memory_space<vmem>>, vector<4x512xf32>,
    %c7_i32 = arith.constant 7 : i32
    %114 = arith.cmpi eq, %arg1, %c7_i32 : i32
    %115 = arith.extui %114 : i1 to i32
    %c0_i32_42 = arith.constant 0 : i32
    %116 = arith.cmpi ne, %115, %c0_i32_42 : i32
    scf.if %116 {
      %c0_43 = arith.constant 0 : index
      %c0_44 = arith.constant 0 : index
      %117 = vector.load %arg7[%c0_43, %c0_44] : memref<4x512xf32, #tpu.memory_space<vmem>>, vector<4x512xf32>
      %cst_45 = arith.constant -1.000000e+00 : f32
      %cst_46 = arith.constant 1.000000e+00 : f32
      %118 = vector.broadcast %cst_45 : f32 to vector<4x512xf32>
      %119 = arith.maximumf %118, %117 : vector<4x512xf32>
      %120 = vector.broadcast %cst_46 : f32 to vector<4x512xf32>
      %121 = arith.minimumf %120, %119 : vector<4x512xf32>
      %c0_47 = arith.constant 0 : index
      %c0_48 = arith.constant 0 : index
      %122 = vector.load %arg6[%c0_47, %c0_48] : memref<4x512xf32, #tpu.memory_space<vmem>>, vector<4x512xf32>
      tpu.vector_store %arg6[%c0_47, %c0_48], %121 {strides = array<i32>} : memref<4x512xf32, #tpu.memory_space<vmem>>, vector<4x512xf32>,
    } else {
    }
    return
  }
  func.func @transform_0(%arg0: i32, %arg1: i32) -> (i32, i32) {
    %c0_i32 = arith.constant 0 : i32
    %c0_i32_0 = arith.constant 0 : i32
    %c0_i32_1 = arith.constant 0 : i32
    return %c0_i32, %c0_i32_0 : i32, i32
  }
  func.func @transform_1(%arg0: i32, %arg1: i32) -> (i32, i32) {
    %c0_i32 = arith.constant 0 : i32
    %c0_i32_0 = arith.constant 0 : i32
    %c0_i32_1 = arith.constant 0 : i32
    return %c0_i32, %c0_i32_0 : i32, i32
  }
  func.func @transform_2(%arg0: i32, %arg1: i32) -> (i32, i32) {
    %c0_i32 = arith.constant 0 : i32
    %c0_i32_0 = arith.constant 0 : i32
    return %c0_i32, %arg0 : i32, i32
  }
  func.func @transform_3(%arg0: i32, %arg1: i32) -> (i32, i32, i32) {
    %c0_i32 = arith.constant 0 : i32
    %c0_i32_0 = arith.constant 0 : i32
    return %arg1, %c0_i32, %arg0 : i32, i32, i32
  }
  func.func @transform_4(%arg0: i32, %arg1: i32) -> (i32, i32) {
    %c0_i32 = arith.constant 0 : i32
    %c0_i32_0 = arith.constant 0 : i32
    return %c0_i32, %arg0 : i32, i32
  }
}

</mosaic_0001>

<bundles_post_ra>
// kernel: _vsampler_forward.1
= control target key start
LH: loop header
LB: loop body
LE: loop exit
PB: predicated region body
PF: predicated region fallthrough
CT: control target
= control target key end

     0   :  { %9 = vsyncpa [#allocation4], 0  ;;  %s1162_s0 = inlined_call_operand.vmem [shape: f32[8,8], index: 0, kind: input, shape index: {}]   ;;  %s1163_s1 = inlined_call_operand.vmem [shape: f32[4,4], index: 1, kind: input, shape index: {}]   ;;  %s1164_s2 = inlined_call_operand.vmem [shape: f32[4,512], index: 2, kind: input, shape index: {}]   ;;  %s1165_s3 = inlined_call_operand.vmem [shape: f32[8,4,512], index: 3, kind: input, shape index: {}]   ;;  %s1166_s4 = inlined_call_operand.vmem [shape: f32[4,512], index: 4, kind: output, shape index: {}]  }
   0x1   :  { %10 = vsyncpa [#allocation6], 0  ;;  %s947_s15 = smov 0   ;;  %s949_s16 = smov 0  }
   0x2   :  { %s951_s17 = smov 0  }
   0x3 LB: > { %s743_s18 = sadd.s32 4294967295, %s918_s17   ;;  %s25_s19 = sadd.s32 1, %s914_s16  ;;  %s918_s17 = sphi %s951_s17, %s16_s17   ;;  %s914_s16 = sphi %s949_s16, %s1176_s16   ;;  %s910_s15 = sphi %s947_s15, %s1175_s15  }
   0x4   : > { %p26_p0 = scmp.ge.s32.totalorder %s25_s19, 8  ;;  %p744_p1 = scmp.ge.s32.totalorder %s918_s17, 1 }
   0x5   : > { %p155_p2 = scmp.lt.s32.totalorder %s918_s17, 9  ;;  %p972_p4 = scmp.eq.s32.totalorder %s743_s18, 0 }
   0x6   : > { %s1178_s19 = smov (%p26_p0, %s25_s19), 0  ;;  %s168_s24 = sshll.u32 %s1162_s0, 4  ;;  %s169_s24 = int_to_ptr.vmem [resolvable:$true] %s168_s24 }
   0x7   : > { %p968_p3 = pnand %p744_p1, %p155_p2  ;;  %s179_s27 = sshll.u32 %s1163_s1, 4  ;;  %s180_s27 = int_to_ptr.vmem [resolvable:$true] %s179_s27 }
   0x8   : > { %s1171_s21 = scalar_select %p972_p4, 1, 0 }
   0x9   : > { %s1170_s20 = scalar_select %p968_p3, 1, 0 }
   0xa   : > { %p813_p5 = pneg %p968_p3  ;;  %s858_s29 = scalar_lea.vmem %s169_s24, 128 }
   0xb   : > { %p859_p7 = scmp.ne.s32.totalorder %s169_s24, %s858_s29  ;;  %p866_p11 = scmp.lt.s32.totalorder %s169_s24, %s169_s24 }
   0xc   : > { %p986_p6 = pnand %p972_p4, %p813_p5  ;;  %p867_p12 = scmp.lt.s32.totalorder %s858_s29, %s858_s29 }
   0xe   : > { %p860_p8 = pneg %p986_p6  ;;  %p868_p13 = por %p867_p12, %p866_p11 }
  0x10   : > { %p861_p9 = pnand %p860_p8, %p859_p7 }
  0x12   : > { %p862_p10 = pneg %p861_p9 }
  0x14   : > { %p869_p0 = pnand %p868_p13, %p862_p10 }
  0x16   : > { %872 = shalt.err (!%p869_p0)
}
  0x17   : > { %s920_s30 = smov [#allocation3]   ;;  %s873_s5 = scalar_lea.vmem %s180_s27, 64 }
  0x18   : > { %816 = dma.vmem_to_smem (!%p986_p6), %s169_s24, 128, %s920_s30, [#allocation4]  }
  0x19   : > { %p874_p1 = scmp.ne.s32.totalorder %s180_s27, %s873_s5  ;;  %p881_p4 = scmp.lt.s32.totalorder %s180_s27, %s180_s27 }
  0x1a   : > { %p882_p3 = scmp.lt.s32.totalorder %s873_s5, %s873_s5 }
  0x1b   : > { %p876_p2 = pnand %p874_p1, %p860_p8 }
  0x1c   : > { %p883_p7 = por %p882_p3, %p881_p4 }
  0x1d   : > { %p877_p5 = pneg %p876_p2 }
  0x1f   : > { %p884_p9 = pnand %p883_p7, %p877_p5 }
  0x21   : > { %887 = shalt.err (!%p884_p9)
}
  0x22   : > { %s921_s6 = smov [#allocation5]   ;;  %p1173_p10 = scmp.ne.s32.totalorder %s1170_s20, 0 }
  0x23   : > { %819 = dma.vmem_to_smem (!%p986_p6), %s180_s27, 64, %s921_s6, [#allocation6]  }
  0x24   : > { %214 = sbr.rel (%p1173_p10) target bundleno = 134 (0x86), region = 36  ;;  %p1174_p11 = scmp.ne.s32.totalorder (!%p1173_p10), %s1171_s21, 0 }
  0x2b   : > { %901 = dma.done.wait (%p1174_p11), [#allocation4], 128  }
  0x2c   : > { %903 = vsyncadd (%p1174_p11), [#allocation4], 4294967168 }
  0x2d   : > { %905 = dma.done.wait (%p1174_p11), [#allocation6], 64  }
  0x2e   : > { %907 = vsyncadd (%p1174_p11), [#allocation6], 4294967232 }
  0x2f   : > { %224 = sfence }
  0x30   : > { %p261_p3 = scmp.lt.s32.totalorder %s910_s15, 7  ;;  %p754_p4 = scmp.ne.s32.totalorder %s910_s15, 0 }
  0x31   : > { %v280_v0 = vld [vmem:[%s1164_s2] sm:$0xff] (!%p754_p4)  ;;  %v281_v1 = vld [vmem:[%s1164_s2 + $0x8] sm:$0xff] (!%p754_p4) }
  0x32   : > { %s262_s7 = scalar_select %p261_p3, %s910_s15, 7 }
  0x33   : > { %279 = sbr.rel (%p754_p4) target bundleno = 58 (0x3a), region = 48  ;;  %282 = vst [vmem:[#allocation2] sm:$0xff] (!%p754_p4), %v280_v0  ;;  %283 = vst [vmem:[#allocation2 + $0x8] sm:$0xff] (!%p754_p4), %v281_v1 }
  0x34   : > { %s804_s8 = sshll.u32 %s262_s7, 4 }
  0x35   : > { %s1011_s11 = scalar_lea.vmem %s1165_s3, %s804_s8 }
  0x3a PF: > { %s296_s20 = sld [smem:[#allocation5]]  ;;  %v482_v2 = vlaneseq  ;;  %s756_s21 = sld [smem:[#allocation5 + $0x1]]  ;;  %v1024_v5 = vld [vmem:[#allocation2] sm:$0xff]  ;;  %v1026_v6 = vld [vmem:[#allocation2 + $0x8] sm:$0xff]  ;;  %vm568_vm0 = vcmask 1040384   ;;  %vm573_vm1 = vcmask 1041408  }
  0x3b   : > { %s759_s22 = sld [smem:[#allocation5 + $0x2]]  ;;  %s762_s23 = sld [smem:[#allocation5 + $0x3]]  ;;  %vm578_vm2 = vcmask 1042432  }
  0x3c   : > { %v483_v3 = vshrl.u32 %v482_v2, 7  ;;  %s1020_s24 = sld [smem:[#allocation5 + $0x80]]  ;;  %s1022_s25 = sld [smem:[#allocation5 + $0x81]] }
  0x3d   : > { %s1028_s26 = sld [smem:[#allocation5 + $0x82]]  ;;  %s1030_s27 = sld [smem:[#allocation5 + $0x83]] }
  0x3e   : > { %v1032_v7 = vsub.s32 0, %v483_v3  ;;  %v1036_v11 = vsub.s32 4, %v483_v3  ;;  %s1044_s28 = sld [smem:[#allocation5 + $0x100]]  ;;  %s1046_s29 = sld [smem:[#allocation5 + $0x101]] }
  0x3f   : > { %s1050_s30 = sld [smem:[#allocation5 + $0x102]]  ;;  %s1052_s5 = sld [smem:[#allocation5 + $0x103]] }
  0x40   : > { %v297_v4 = vstv %s296_s20  ;;  %v301_v10 = vstv %s756_s21  ;;  %s1064_s6 = sld [smem:[#allocation5 + $0x180]]  ;;  %s1066_s7 = sld [smem:[#allocation5 + $0x181]] }
  0x41   : > { %v298_v8 = vmul.f32 %v297_v4, %v1024_v5  ;;  %v299_v9 = vmul.f32 %v297_v4, %v1026_v6  ;;  %v302_v12 = vmul.f32 %v301_v10, %v1024_v5  ;;  %v303_v13 = vmul.f32 %v301_v10, %v1026_v6  ;;  %s1072_s8 = sld [smem:[#allocation5 + $0x182]]  ;;  %s1074_s9 = sld [smem:[#allocation5 + $0x183]] }
  0x42   : > { %v315_v14 = vstv %s759_s22  ;;  %v329_v15 = vstv %s762_s23  ;;  %v343_v22 = vstv %s1020_s24  ;;  %v347_v23 = vstv %s1022_s25  ;;  %s1111_s10 = sshll.u32 %s910_s15, 7  ;;  %p797_p6 = scmp.ne.s32.totalorder %s910_s15, 7 }
  0x43   : > { %v316_v16 = vmul.f32 %v315_v14, %v1024_v5  ;;  %v317_v17 = vmul.f32 %v315_v14, %v1026_v6  ;;  %v330_v18 = vmul.f32 %v329_v15, %v1024_v5  ;;  %v331_v19 = vmul.f32 %v329_v15, %v1026_v6  ;;  %s286_s12 = sadd.s32 1, %s1111_s10  ;;  %s285_s14 = sld [smem:[#allocation3 + %s1111_s10]] }
  0x44   : > { %v757_v20 = vrot.slane %v302_v12, 9  ;;  %v758_v21 = vrot.slane %v303_v13, 9  ;;  %v344_v30 = vmul.f32 %v343_v22, %v1024_v5  ;;  %v345_v31 = vmul.f32 %v343_v22, %v1026_v6  ;;  %s287_s13 = sld [smem:[#allocation3 + %s286_s12]]  ;;  %s288_s18 = sadd.s32 2, %s1111_s10 }
  0x45   : > { %v760_v24 = vrot.slane %v316_v16, 10  ;;  %v761_v25 = vrot.slane %v317_v17, 10  ;;  %v763_v26 = vrot.slane %v330_v18, 11  ;;  %v764_v27 = vrot.slane %v331_v19, 11  ;;  %s290_s20 = sadd.s32 3, %s1111_s10  ;;  %s292_s21 = sadd.s32 4, %s1111_s10 }
  0x46   : > { %v312_v28 = vadd.f32 %v757_v20, %v298_v8  ;;  %v313_v29 = vadd.f32 %v758_v21, %v299_v9  ;;  %v348_v32 = vmul.f32 %v347_v23, %v1024_v5  ;;  %v349_v33 = vmul.f32 %v347_v23, %v1026_v6  ;;  %s289_s22 = sld [smem:[#allocation3 + %s288_s18]] }
  0x47   : > { %v361_v34 = vstv %s1028_s26  ;;  %v375_v35 = vstv %s1030_s27  ;;  %v389_v52 = vstv %s1044_s28  ;;  %v393_v53 = vstv %s1046_s29  ;;  %s291_s23 = sld [smem:[#allocation3 + %s290_s20]] }
  0x48   : > { %v326_v36 = vadd.f32 %v760_v24, %v312_v28  ;;  %v327_v37 = vadd.f32 %v761_v25, %v313_v29  ;;  %v362_v38 = vmul.f32 %v361_v34, %v1024_v5  ;;  %v363_v39 = vmul.f32 %v361_v34, %v1026_v6  ;;  %s293_s24 = sld [smem:[#allocation3 + %s292_s21]] }
  0x49   : > { %v767_v40 = vrot.slane %v348_v32, 9  ;;  %v768_v41 = vrot.slane %v349_v33, 9  ;;  %v376_v42 = vmul.f32 %v375_v35, %v1024_v5  ;;  %v377_v43 = vmul.f32 %v375_v35, %v1026_v6 }
  0x4a   : > { %v1068_v44 = vadd.f32 %v763_v26, %v326_v36  ;;  %v1070_v45 = vadd.f32 %v764_v27, %v327_v37  ;;  %v770_v46 = vrot.slane %v362_v38, 10  ;;  %v771_v47 = vrot.slane %v363_v39, 10 }
  0x4b   : > { %v358_v48 = vadd.f32 %v767_v40, %v344_v30  ;;  %v359_v49 = vadd.f32 %v768_v41, %v345_v31  ;;  %v773_v50 = vrot.slane %v376_v42, 11  ;;  %v774_v51 = vrot.slane %v377_v43, 11 }
  0x4c   : > { %v407_v54 = vstv %s1050_s30  ;;  %v421_v55 = vstv %s1052_s5  ;;  %v390_v58 = vmul.f32 %v389_v52, %v1024_v5  ;;  %v391_v59 = vmul.f32 %v389_v52, %v1026_v6 }
  0x4d   : > { %v372_v56 = vadd.f32 %v770_v46, %v358_v48  ;;  %v373_v57 = vadd.f32 %v771_v47, %v359_v49  ;;  %v394_v60 = vmul.f32 %v393_v53, %v1024_v5  ;;  %v395_v61 = vmul.f32 %v393_v53, %v1026_v6 }
  0x4e   : > { %v408_v62 = vmul.f32 %v407_v54, %v1024_v5  ;;  %v409_v63 = vmul.f32 %v407_v54, %v1026_v6  ;;  %v422_v2 = vmul.f32 %v421_v55, %v1024_v5  ;;  %v423_v3 = vmul.f32 %v421_v55, %v1026_v6 }
  0x4f   : > { %v386_v0 = vadd.f32 %v773_v50, %v372_v56  ;;  %v387_v1 = vadd.f32 %v774_v51, %v373_v57  ;;  %v777_v4 = vrot.slane %v394_v60, 9  ;;  %v778_v8 = vrot.slane %v395_v61, 9 }
  0x50   : > { %v780_v9 = vrot.slane %v408_v62, 10  ;;  %v781_v10 = vrot.slane %v409_v63, 10  ;;  %v783_v12 = vrot.slane %v422_v2, 11  ;;  %v784_v13 = vrot.slane %v423_v3, 11 }
  0x51   : > { %v435_v14 = vstv %s1064_s6  ;;  %v439_v15 = vstv %s1066_s7  ;;  %v404_v16 = vadd.f32 %v777_v4, %v390_v58  ;;  %v405_v17 = vadd.f32 %v778_v8, %v391_v59 }
  0x52   : > { %v436_v18 = vmul.f32 %v435_v14, %v1024_v5  ;;  %v437_v19 = vmul.f32 %v435_v14, %v1026_v6  ;;  %v440_v20 = vmul.f32 %v439_v15, %v1024_v5  ;;  %v441_v21 = vmul.f32 %v439_v15, %v1026_v6 }
  0x53   : > { %v453_v22 = vstv %s1072_s8  ;;  %v467_v23 = vstv %s1074_s9  ;;  %v418_v24 = vadd.f32 %v780_v9, %v404_v16  ;;  %v419_v25 = vadd.f32 %v781_v10, %v405_v17 }
  0x54   : > { %v454_v26 = vmul.f32 %v453_v22, %v1024_v5  ;;  %v455_v27 = vmul.f32 %v453_v22, %v1026_v6  ;;  %v787_v28 = vrot.slane %v440_v20, 9  ;;  %v788_v29 = vrot.slane %v441_v21, 9 }
  0x55   : > { %v468_v30 = vmul.f32 %v467_v23, %v1024_v5  ;;  %v469_v31 = vmul.f32 %v467_v23, %v1026_v6  ;;  %v432_v32 = vadd.f32 %v783_v12, %v418_v24  ;;  %v433_v33 = vadd.f32 %v784_v13, %v419_v25 }
  0x56   : > { %v790_v34 = vrot.slane %v454_v26, 10  ;;  %v791_v35 = vrot.slane %v455_v27, 10  ;;  %v450_v36 = vadd.f32 %v787_v28, %v436_v18  ;;  %v451_v37 = vadd.f32 %v788_v29, %v437_v19  ;;  %v617_v27 = vld [vmem:[%s1011_s11] sm:$0xff] }
  0x57   : > { %v793_v38 = vrot.slane %v468_v30, 11  ;;  %v794_v39 = vrot.slane %v469_v31, 11  ;;  %v485_v40 = vrot.slane %v1068_v44, %v1032_v7  ;;  %v489_v41 = vrot.slane %v1068_v44, %v1036_v11 }
  0x58   : > { %v493_v42 = vrot.slane %v1070_v45, %v1032_v7  ;;  %v497_v43 = vrot.slane %v1070_v45, %v1036_v11  ;;  %v464_v46 = vadd.f32 %v790_v34, %v450_v36  ;;  %v465_v47 = vadd.f32 %v791_v35, %v451_v37 }
  0x59   : > { %v507_v48 = vrot.slane %v386_v0, %v1032_v7  ;;  %v511_v49 = vrot.slane %v386_v0, %v1036_v11  ;;  %v515_v50 = vrot.slane %v387_v1, %v1032_v7  ;;  %v519_v51 = vrot.slane %v387_v1, %v1036_v11 }
  0x5a   : > { %v529_v44 = vrot.slane %v432_v32, %v1032_v7  ;;  %v533_v52 = vrot.slane %v432_v32, %v1036_v11  ;;  %v478_v53 = vadd.f32 %v793_v38, %v464_v46  ;;  %v479_v54 = vadd.f32 %v794_v39, %v465_v47  ;;  %v618_v32 = vld [vmem:[%s1011_s11 + $0x8] sm:$0xff] }
  0x5b   : > { %v537_v45 = vrot.slane %v433_v33, %v1032_v7  ;;  %v541_v55 = vrot.slane %v433_v33, %v1036_v11  ;;  %v569_v56 = vsel %vm568_vm0, %v485_v40, %v507_v48  ;;  %v570_v57 = vsel %vm568_vm0, %v489_v41, %v511_v49 }
  0x5c   : > { %v571_v58 = vsel %vm568_vm0, %v493_v42, %v515_v50  ;;  %v572_v59 = vsel %vm568_vm0, %v497_v43, %v519_v51  ;;  %v551_v60 = vrot.slane %v478_v53, %v1032_v7  ;;  %v555_v61 = vrot.slane %v478_v53, %v1036_v11 }
  0x5d   : > { %v559_v62 = vrot.slane %v479_v54, %v1032_v7  ;;  %v563_v63 = vrot.slane %v479_v54, %v1036_v11  ;;  %v574_v0 = vsel %vm573_vm1, %v569_v56, %v529_v44  ;;  %v575_v1 = vsel %vm573_vm1, %v570_v57, %v533_v52 }
  0x5e   : > { %v576_v2 = vsel %vm573_vm1, %v571_v58, %v537_v45  ;;  %v577_v3 = vsel %vm573_vm1, %v572_v59, %v541_v55  ;;  %v579_v4 = vsel %vm578_vm2, %v574_v0, %v551_v60  ;;  %v580_v8 = vsel %vm578_vm2, %v575_v1, %v555_v61 }
  0x5f   : > { %v581_v9 = vsel %vm578_vm2, %v576_v2, %v559_v62  ;;  %v582_v7 = vsel %vm578_vm2, %v577_v3, %v563_v63  ;;  %850 = vtanh.f32 %v579_v4  ;;  %v590_v11 = vstv %s287_s13 }
  0x60   : > { %852 = vtanh.f32 %v580_v8  ;;  %v587_v10 = vstv %s285_s14  ;;  %v609_v23 = vstv %s289_s22  ;;  %v612_v26 = vstv %s291_s23 }
  0x61   : > { %854 = vtanh.f32 %v581_v9  ;;  %v588_v16 = vmul.f32 %v587_v10, %v1024_v5  ;;  %v589_v20 = vmul.f32 %v587_v10, %v1026_v6  ;;  %v619_v28 = vstv %s293_s24 }
  0x62   : > { %856 = vtanh.f32 %v582_v7  ;;  %v610_v31 = vmul.f32 %v609_v23, %v1024_v5  ;;  %v611_v34 = vmul.f32 %v609_v23, %v1026_v6  ;;  %v620_v36 = vmul.f32 %v619_v28, %v617_v27 }
  0x63   : > { %v621_v39 = vmul.f32 %v619_v28, %v618_v32 }
  0x69   : > { %v851_v12 = vpop.eup %850 }
  0x6a   : > { %v853_v13 = vpop.eup %852  ;;  %v591_v14 = vmul.f32 %v851_v12, %v590_v11 }
  0x6b   : > { %v855_v15 = vpop.eup %854  ;;  %v592_v17 = vmul.f32 %v853_v13, %v590_v11 }
  0x6c   : > { %v857_v18 = vpop.eup %856  ;;  %v593_v19 = vmul.f32 %v855_v15, %v590_v11 }
  0x6d   : > { %v594_v21 = vmul.f32 %v857_v18, %v590_v11  ;;  %v599_v22 = vcombine.low %v591_v14, %v592_v17 }
  0x6f   : > { %v600_v24 = vcombine.low %v593_v19, %v594_v21  ;;  %v603_v25 = vsub.f32 %v588_v16, %v599_v22 }
  0x71   : > { %v604_v29 = vsub.f32 %v589_v20, %v600_v24  ;;  %v795_v30 = vclamps-f32 %v603_v25, 1.0 }
  0x73   : > { %v796_v33 = vclamps-f32 %v604_v29, 1.0  ;;  %v613_v35 = vmul.f32 %v795_v30, %v612_v26 }
  0x75   : > { %v614_v37 = vmul.f32 %v796_v33, %v612_v26  ;;  %v615_v38 = vadd.f32 %v613_v35, %v610_v31  ;;  %629 = sbr.rel (%p797_p6) target bundleno = 134 (0x86), region = 52 }
  0x77   : > { %v616_v40 = vadd.f32 %v614_v37, %v611_v34  ;;  %v622_v41 = vadd.f32 %v620_v36, %v615_v38 }
  0x79   : > { %v623_v42 = vadd.f32 %v621_v39, %v616_v40  ;;  %624 = vst [vmem:[#allocation2] sm:$0xff] %v622_v41 }
  0x7b   : > { %625 = vst [vmem:[#allocation2 + $0x8] sm:$0xff] %v623_v42 }
  0x80   : > { %v630_v43 = vld [vmem:[#allocation2] sm:$0xff] }
  0x81   : > { %v798_v5 = vclamps-f32 %v630_v43, 1.0 }
  0x82   : > { %v631_v46 = vld [vmem:[#allocation2 + $0x8] sm:$0xff] }
  0x83   : > { %v799_v47 = vclamps-f32 %v631_v46, 1.0  ;;  %636 = vst [vmem:[%s1166_s4] sm:$0xff] %v798_v5 }
  0x85   : > { %637 = vst [vmem:[%s1166_s4 + $0x8] sm:$0xff] %v799_v47 }
  0x86 PF: > { %s16_s17 = sadd.s32 1, %s918_s17   ;;  %s1175_s15 = smov %s914_s16 }
  0x87   : > { %p13_p8 = scmp.ge.s32.totalorder %s16_s17, 10   ;;  %s1176_s16 = smov %s1178_s19 }
  0x89   :  { %15 = sbr.rel (!%p13_p8) target bundleno = 3 (0x3), region = 86 }
  0x90   :  { %660 = vsyncpa [#allocation4], 1 }
  0x91   :  { %662 = vsyncpa [#allocation4 + $0x1], 1 }
  0x92   :  { %663 = vsyncpa [#allocation6], 1 }

</bundles_post_ra>
